<compile_context>
chip_gen: v5e
topology: v5e:2x2
jax: 0.10.0
libtpu: 0.0.40
codegen_flags: <defaults>
</compile_context>

<pallas_src>
import jax
import jax.numpy as jnp
from jax.experimental import pallas as pl
from jax.experimental.pallas import tpu as pltpu


def _round_up(v, m):
    return ((v + m - 1) // m) * m


def _device_tile_prefs():
    """Per-generation (tn, tk) preferences.

    v5e MXU is 4x128^2 -> 128-wide N tiles; v6e/v7x MXU is 2x256^2 -> 256-wide
    N tiles fill the native matmul.  Large tk amortizes the ~0.35us/grid-step
    overhead and accumulator traffic.
    """
    try:
        kind = jax.devices()[0].device_kind.lower()
    except Exception:
        kind = ""
    if "v5 lite" in kind or "v5lite" in kind or "v5e" in kind:
        return 128, 512
    return 256, 1024


def _linear_kernel(x_ref, w_ref, b_ref, o_ref):
    """One (tm, tn) output tile; K is the last ('arbitrary') grid axis.

    The f32 output block stays resident in VMEM across the K axis, so we
    accumulate straight into it (no separate scratch).  Bias is written at
    k == 0, so it is added exactly once.  x arrives f32 and is cast to bf16
    in-VMEM to hit the native bf16 MXU path with f32 accumulation.
    """
    k = pl.program_id(2)

    @pl.when(k == 0)
    def _():
        o_ref[...] = jnp.broadcast_to(b_ref[...], o_ref.shape)

    o_ref[...] += jnp.dot(
        x_ref[...].astype(jnp.bfloat16),
        w_ref[...],
        preferred_element_type=jnp.float32,
    )


def pallas_linear_padded(x_flat, w_padded, b_padded, n_out, *, tn, tk):
    """y = x_flat @ W + b with pre-padded bf16 W and pre-padded f32 b.

    x_flat: [B, K] float32      w_padded: [K_pad, N_pad] bfloat16
    b_padded: [1, N_pad] float32.   Returns [B, n_out] float32.
    """
    B, K = x_flat.shape
    K_pad, N_pad = w_padded.shape
    assert K_pad % tk == 0 and N_pad % tn == 0 and K <= K_pad
    assert b_padded.shape == (1, N_pad)

    # Small-batch friendly M tile: pad only to the 16-row sublane multiple,
    # not to 128.  Lane density (what matters for vst) lives on the N axis.
    tm = min(128, _round_up(B, 16))
    M_pad = _round_up(B, tm)

    x_p = x_flat
    if (M_pad, K_pad) != (B, K):
        x_p = jnp.pad(x_flat, ((0, M_pad - B), (0, K_pad - K)))

    grid = (M_pad // tm, N_pad // tn, K_pad // tk)

    # VMEM footprint: double-buffered f32 x tile + bf16 w tile, resident f32
    # output tile (x2 for pipelining across i/j), tiny bias.  Headroom x4,
    # capped at 48 MiB (safe on v7x's 64 MiB/TC, plenty on v5e/v6e 128 MiB).
    need = (
        2 * (tm * tk * 4 + tk * tn * 2)
        + 2 * (tm * tn * 4)
        + 2 * (tn * 4)
    )
    vmem_limit = int(min(48 * 1024 * 1024, max(16 * 1024 * 1024, 4 * need)))

    # bytes_accessed reflects re-reads under this grid: x is re-read once per
    # N tile, w once per M tile.
    cost = pl.CostEstimate(
        flops=2 * M_pad * K_pad * N_pad,
        transcendentals=0,
        bytes_accessed=int(
            M_pad * K_pad * 4 * (N_pad // tn)
            + K_pad * N_pad * 2 * (M_pad // tm)
            + N_pad * 4 * (M_pad // tm)
            + M_pad * N_pad * 4
        ),
    )

    out = pl.pallas_call(
        _linear_kernel,
        out_shape=jax.ShapeDtypeStruct((M_pad, N_pad), jnp.float32),
        grid_spec=pltpu.PrefetchScalarGridSpec(
            num_scalar_prefetch=0,
            grid=grid,
            in_specs=[
                pl.BlockSpec((tm, tk), lambda i, j, k: (i, k)),
                pl.BlockSpec((tk, tn), lambda i, j, k: (k, j)),
                pl.BlockSpec((1, tn), lambda i, j, k: (0, j)),
            ],
            out_specs=pl.BlockSpec((tm, tn), lambda i, j, k: (i, j)),
        ),
        compiler_params=pltpu.CompilerParams(
            dimension_semantics=("parallel", "parallel", "arbitrary"),
            vmem_limit_bytes=vmem_limit,
        ),
        cost_estimate=cost,
    )(x_p, w_padded, b_padded)

    return out[:B, :n_out]


class InnerModel:
    """Synthetic deterministic inner model: flatten -> linear embedding.

    Weight cast and tile-aligned padding are hoisted here (done once at
    init), so the forward pass never re-streams the [K, N] weight through an
    extra cast/pad pair in HBM.
    """

    def __init__(self, in_features, out_features, key):
        k_w, k_b = jax.random.split(key)
        scale = 1.0 / jnp.sqrt(jnp.float32(in_features))
        self.w = jax.random.uniform(
            k_w, (in_features, out_features), jnp.float32, -scale, scale
        )
        self.b = jax.random.uniform(
            k_b, (1, out_features), jnp.float32, -scale, scale
        )

        tn_pref, tk_pref = _device_tile_prefs()
        self.tn = min(tn_pref, _round_up(out_features, 128))
        self.tk = min(tk_pref, _round_up(in_features, 128))
        k_pad = _round_up(in_features, self.tk)
        n_pad = _round_up(out_features, self.tn)

        self.n_out = out_features
        self.w_padded = jnp.pad(
            self.w.astype(jnp.bfloat16),
            ((0, k_pad - in_features), (0, n_pad - out_features)),
        )
        self.b_padded = jnp.pad(self.b, ((0, 0), (0, n_pad - out_features)))

    def __call__(self, x):
        # x: NCHW [B, C, H, W] -> [B, C*H*W]  (glue, plain JAX)
        B = x.shape[0]
        x_flat = x.reshape(B, -1)
        return pallas_linear_padded(
            x_flat, self.w_padded, self.b_padded, self.n_out,
            tn=self.tn, tk=self.tk,
        )


class WarpModule:
    """JAX equivalent of unicom/retrieval.py::WarpModule — pure pass-through."""

    def __init__(self, model):
        self.model = model

    def __call__(self, x):
        return self.model(x)


if __name__ == "__main__":
    key = jax.random.PRNGKey(0)
    k_x, k_m = jax.random.split(key)

    B, C, H, W = 2, 4, 16, 16      # NCHW input, as in PyTorch
    D = 32                         # embedding dim

    x = jax.random.normal(k_x, (B, C, H, W), jnp.float32)

    inner = InnerModel(C * H * W, D, k_m)
    warp = WarpModule(inner)

    out = warp(x)
    out = jax.block_until_ready(out)

    # Reference check against plain JAX using the same bf16-rounded operands
    # (kernel casts x and uses a bf16 weight on the MXU, f32 accumulation).
    x_bf = x.reshape(B, -1).astype(jnp.bfloat16).astype(jnp.float32)
    w_bf = inner.w.astype(jnp.bfloat16).astype(jnp.float32)
    ref = x_bf @ w_bf + inner.b

    assert out.shape == (B, D)
    assert jnp.allclose(out, ref, atol=1e-2, rtol=1e-2)

    print("KERNEL_OK")
</pallas_src>

<mosaic_0001>
module attributes {stable_mosaic.version = 11 : i64} {
  func.func @_linear_kernel(%arg0: i32, %arg1: i32, %arg2: i32, %arg3: memref<16x1024xf32, #tpu.memory_space<vmem>>, %arg4: memref<1024x128xbf16, #tpu.memory_space<vmem>>, %arg5: memref<1x128xf32, #tpu.memory_space<vmem>>, %arg6: memref<16x128xf32, #tpu.memory_space<vmem>>) attributes {dimension_semantics = [#tpu.dimension_semantics<parallel>, #tpu.dimension_semantics<parallel>, #tpu.dimension_semantics<arbitrary>], iteration_bounds = array<i64: 1, 1, 1>, scalar_prefetch = 0 : i64, scratch_operands = 0 : i64, tpu.core_type = #tpu.core_type<tc>, window_params = [{transform_indices = @transform_0, window_bounds = array<i64: 16, 1024>}, {transform_indices = @transform_1, window_bounds = array<i64: 1024, 128>}, {transform_indices = @transform_2, window_bounds = array<i64: 1, 128>}, {transform_indices = @transform_3, window_bounds = array<i64: 16, 128>}]} {
    %c0_i32 = arith.constant 0 : i32
    %0 = arith.cmpi eq, %arg2, %c0_i32 : i32
    %1 = arith.extui %0 : i1 to i32
    %c0_i32_0 = arith.constant 0 : i32
    %2 = arith.cmpi ne, %1, %c0_i32_0 : i32
    scf.if %2 {
      %c0_8 = arith.constant 0 : index
      %c0_9 = arith.constant 0 : index
      %10 = vector.load %arg5[%c0_8, %c0_9] : memref<1x128xf32, #tpu.memory_space<vmem>>, vector<1x128xf32>
      %11 = vector.shape_cast %10 : vector<1x128xf32> to vector<1x128xf32>
      %12 = vector.broadcast %11 : vector<1x128xf32> to vector<16x128xf32>
      %c0_10 = arith.constant 0 : index
      %c0_11 = arith.constant 0 : index
      %13 = vector.load %arg6[%c0_10, %c0_11] : memref<16x128xf32, #tpu.memory_space<vmem>>, vector<16x128xf32>
      tpu.vector_store %arg6[%c0_10, %c0_11], %12 {strides = array<i32>} : memref<16x128xf32, #tpu.memory_space<vmem>>, vector<16x128xf32>,
    } else {
    }
    %c0 = arith.constant 0 : index
    %c0_1 = arith.constant 0 : index
    %3 = vector.load %arg6[%c0, %c0_1] : memref<16x128xf32, #tpu.memory_space<vmem>>, vector<16x128xf32>
    %c0_2 = arith.constant 0 : index
    %c0_3 = arith.constant 0 : index
    %4 = vector.load %arg3[%c0_2, %c0_3] : memref<16x1024xf32, #tpu.memory_space<vmem>>, vector<16x1024xf32>
    %5 = arith.truncf %4 : vector<16x1024xf32> to vector<16x1024xbf16>
    %c0_4 = arith.constant 0 : index
    %c0_5 = arith.constant 0 : index
    %6 = vector.load %arg4[%c0_4, %c0_5] : memref<1024x128xbf16, #tpu.memory_space<vmem>>, vector<1024x128xbf16>
    %cst = arith.constant dense<0.000000e+00> : vector<16x128xf32>
    %7 = tpu.matmul %5, %6, %cst {dimension_numbers = #tpu.dot_dimension_numbers<[1], [0], [0], [1], [0, 0, 1, 1], [], []>} : vector<16x1024xbf16>, vector<1024x128xbf16>, vector<16x128xf32> -> vector<16x128xf32>
    %8 = arith.addf %3, %7 : vector<16x128xf32>
    %c0_6 = arith.constant 0 : index
    %c0_7 = arith.constant 0 : index
    %9 = vector.load %arg6[%c0_6, %c0_7] : memref<16x128xf32, #tpu.memory_space<vmem>>, vector<16x128xf32>
    tpu.vector_store %arg6[%c0_6, %c0_7], %8 {strides = array<i32>} : memref<16x128xf32, #tpu.memory_space<vmem>>, vector<16x128xf32>,
    return
  }
  func.func @transform_0(%arg0: i32, %arg1: i32, %arg2: i32) -> (i32, i32) {
    %c0_i32 = arith.constant 0 : i32
    return %arg0, %arg2 : i32, i32
  }
  func.func @transform_1(%arg0: i32, %arg1: i32, %arg2: i32) -> (i32, i32) {
    %c0_i32 = arith.constant 0 : i32
    return %arg2, %arg1 : i32, i32
  }
  func.func @transform_2(%arg0: i32, %arg1: i32, %arg2: i32) -> (i32, i32) {
    %c0_i32 = arith.constant 0 : i32
    %c0_i32_0 = arith.constant 0 : i32
    return %c0_i32, %arg1 : i32, i32
  }
  func.func @transform_3(%arg0: i32, %arg1: i32, %arg2: i32) -> (i32, i32) {
    %c0_i32 = arith.constant 0 : i32
    return %arg0, %arg1 : i32, i32
  }
}

</mosaic_0001>

<bundles_post_ra>
// kernel: tpu_custom_call.1
= control target key start
LH: loop header
LB: loop body
LE: loop exit
PB: predicated region body
PF: predicated region fallthrough
CT: control target
= control target key end

     0   :  { %8 = vsyncpa [#allocation3], 0  ;;  %s1178_s0 = inlined_call_operand.hbm [shape: f32[16,1024], index: 0, kind: input, shape index: {}]   ;;  %s1179_s1 = inlined_call_operand.hbm [shape: bf16[1024,128], index: 1, kind: input, shape index: {}]   ;;  %s1180_s2 = inlined_call_operand.vmem [shape: f32[1,128], index: 2, kind: input, shape index: {}]   ;;  %s1181_s3 = inlined_call_operand.hbm [shape: f32[16,128], index: 3, kind: output, shape index: {}]  }
   0x1   :  { %9 = vsyncpa [#allocation6], 0 }
   0x2   :  { %10 = vsyncpa [#allocation4], 0  ;;  %s15_s14 = sshll.u32 %s1178_s0, 4  ;;  %s1138_s15 = smov [#allocation2]   ;;  %s16_s14 = int_to_ptr.hbm [resolvable:$true] %s15_s14 }
   0x3   :  { %s17_s16 = sshll.u32 %s1138_s15, 4  ;;  %s28_s19 = sshll.u32 %s1179_s1, 4  ;;  %s18_s16 = int_to_ptr.vmem [resolvable:$true] %s17_s16  ;;  %s29_s19 = int_to_ptr.hbm [resolvable:$true] %s28_s19 }
   0x4   :  { %s1139_s20 = smov 1024   ;;  %s1140_s21 = smov 64  }
   0x5   :  { %23 = dma.hbm_to_vmem [thread:$0]  %s16_s14, 2048, %s18_s16, [#allocation3], %s1139_s20, %s1139_s20, %s1140_s21  }
   0x6   :  { %s1141_s22 = smov [#allocation5]   ;;  %s1142_s24 = smov 4  }
   0x7   :  { %s30_s23 = sshll.u32 %s1141_s22, 4  ;;  %s31_s23 = int_to_ptr.vmem [resolvable:$true] %s30_s23 }
   0x8   :  { %36 = dma.hbm_to_vmem [thread:$0]  %s29_s19, 8192, %s31_s23, [#allocation6], %s1140_s21, %s1140_s21, %s1142_s24  }
   0x9   :  { %1132 = dma.done.wait [#allocation3], 2048  }
   0xa   :  { %1133 = vsyncadd [#allocation3], 4294965248 }
   0xb   :  { %1134 = dma.done.wait [#allocation6], 8192  }
   0xc   :  { %1135 = vsyncadd [#allocation6], 4294959104  ;;  %v994_v0 = vld [vmem:[#allocation5 + $0x38] sm:$0xff]  ;;  %v993_v4 = vld [vmem:[#allocation5 + $0x30] sm:$0xff]  ;;  %s1143_s25 = smov [#allocation7]   ;;  %s717_s29 = sshll.u32 %s1181_s3, 4  ;;  %s718_s29 = int_to_ptr.hbm [resolvable:$true] %s717_s29 }
   0xd   :  { %v1002_v1 = vld [vmem:[#allocation5 + $0x78] sm:$0xff]  ;;  %595 = vmatpush.bf16.msra.mxu0 %v994_v0  ;;  %v1001_v5 = vld [vmem:[#allocation5 + $0x70] sm:$0xff]  ;;  %v992_v8 = vld [vmem:[#allocation5 + $0x28] sm:$0xff]  ;;  %s715_s26 = sshll.u32 %s1143_s25, 4  ;;  %s1145_s30 = smov 8   ;;  %s716_s26 = int_to_ptr.vmem [resolvable:$true] %s715_s26 }
   0xe   :  { %v1010_v2 = vld [vmem:[#allocation5 + $0xb8] sm:$0xff]  ;;  %609 = vmatpush.bf16.msra.mxu1 %v1002_v1  ;;  %v1009_v6 = vld [vmem:[#allocation5 + $0xb0] sm:$0xff]  ;;  %v1000_v9 = vld [vmem:[#allocation5 + $0x68] sm:$0xff] }
   0xf   :  { %v1018_v3 = vld [vmem:[#allocation5 + $0xf8] sm:$0xff]  ;;  %623 = vmatpush.bf16.msra.mxu2 %v1010_v2  ;;  %v1017_v7 = vld [vmem:[#allocation5 + $0xf0] sm:$0xff]  ;;  %v1008_v10 = vld [vmem:[#allocation5 + $0xa8] sm:$0xff] }
  0x10   :  { %637 = vmatpush.bf16.msra.mxu3 %v1018_v3  ;;  %v1016_v11 = vld [vmem:[#allocation5 + $0xe8] sm:$0xff]  ;;  %v991_v12 = vld [vmem:[#allocation5 + $0x20] sm:$0xff]  ;;  %v990_v16 = vld [vmem:[#allocation5 + $0x18] sm:$0xff] }
  0x11   :  { %596 = vmatpush.bf16.msra.mxu0 %v993_v4  ;;  %v999_v13 = vld [vmem:[#allocation5 + $0x60] sm:$0xff]  ;;  %v998_v17 = vld [vmem:[#allocation5 + $0x58] sm:$0xff]  ;;  %v989_v20 = vld [vmem:[#allocation5 + $0x10] sm:$0xff] }
  0x12   :  { %610 = vmatpush.bf16.msra.mxu1 %v1001_v5  ;;  %v1007_v14 = vld [vmem:[#allocation5 + $0xa0] sm:$0xff]  ;;  %v1006_v18 = vld [vmem:[#allocation5 + $0x98] sm:$0xff]  ;;  %v997_v21 = vld [vmem:[#allocation5 + $0x50] sm:$0xff] }
  0x13   :  { %624 = vmatpush.bf16.msra.mxu2 %v1009_v6  ;;  %v1015_v15 = vld [vmem:[#allocation5 + $0xe0] sm:$0xff]  ;;  %v1014_v19 = vld [vmem:[#allocation5 + $0xd8] sm:$0xff]  ;;  %v1005_v22 = vld [vmem:[#allocation5 + $0x90] sm:$0xff] }
  0x14   :  { %638 = vmatpush.bf16.msra.mxu3 %v1017_v7  ;;  %v1013_v23 = vld [vmem:[#allocation5 + $0xd0] sm:$0xff]  ;;  %v988_v24 = vld [vmem:[#allocation5 + $0x8] sm:$0xff]  ;;  %v987_v28 = vld [vmem:[#allocation5] sm:$0xff] }
  0x15   :  { %597 = vmatpush.bf16.msra.mxu0 %v992_v8  ;;  %v996_v25 = vld [vmem:[#allocation5 + $0x48] sm:$0xff]  ;;  %v995_v29 = vld [vmem:[#allocation5 + $0x40] sm:$0xff]  ;;  %v1026_v32 = vld [vmem:[#allocation5 + $0x138] sm:$0xff] }
  0x16   :  { %611 = vmatpush.bf16.msra.mxu1 %v1000_v9  ;;  %v1004_v26 = vld [vmem:[#allocation5 + $0x88] sm:$0xff]  ;;  %v1003_v30 = vld [vmem:[#allocation5 + $0x80] sm:$0xff]  ;;  %v1034_v33 = vld [vmem:[#allocation5 + $0x178] sm:$0xff] }
  0x17   :  { %625 = vmatpush.bf16.msra.mxu2 %v1008_v10  ;;  %v1012_v27 = vld [vmem:[#allocation5 + $0xc8] sm:$0xff]  ;;  %v1011_v31 = vld [vmem:[#allocation5 + $0xc0] sm:$0xff]  ;;  %v61_v34 = vld [vmem:[#allocation2 + $0x10] sm:$0xff] }
  0x18   :  { %639 = vmatpush.bf16.msra.mxu3 %v1016_v11  ;;  %v69_v35 = vld [vmem:[#allocation2 + $0x50] sm:$0xff]  ;;  %v62_v36 = vld [vmem:[#allocation2 + $0x18] sm:$0xff]  ;;  %v59_v38 = vld [vmem:[#allocation2] sm:$0xff] }
  0x19   :  { %598 = vmatpush.bf16.msra.mxu0 %v991_v12  ;;  %v70_v37 = vld [vmem:[#allocation2 + $0x58] sm:$0xff]  ;;  %v67_v39 = vld [vmem:[#allocation2 + $0x40] sm:$0xff]  ;;  %v60_v40 = vld [vmem:[#allocation2 + $0x8] sm:$0xff]  ;;  %v77_v44 = vpack.c.bf16 %v69_v35, %v61_v34 }
  0x1a   :  { %612 = vmatpush.bf16.msra.mxu1 %v999_v13  ;;  %v68_v41 = vld [vmem:[#allocation2 + $0x48] sm:$0xff]  ;;  %v1042_v42 = vld [vmem:[#allocation5 + $0x1b8] sm:$0xff]  ;;  %v78_v45 = vpack.c.bf16 %v70_v37, %v62_v36  ;;  %v75_v46 = vpack.c.bf16 %v67_v39, %v59_v38  ;;  %v1025_v48 = vld [vmem:[#allocation5 + $0x130] sm:$0xff] }
  0x1b   :  { %626 = vmatpush.bf16.msra.mxu2 %v1007_v14  ;;  %v1050_v43 = vld [vmem:[#allocation5 + $0x1f8] sm:$0xff]  ;;  %v76_v47 = vpack.c.bf16 %v68_v41, %v60_v40  ;;  %v1033_v49 = vld [vmem:[#allocation5 + $0x170] sm:$0xff]  ;;  %v1024_v52 = vld [vmem:[#allocation5 + $0x128] sm:$0xff] }
  0x1c   :  { %640 = vmatpush.bf16.msra.mxu3 %v1015_v15  ;;  %v1041_v50 = vld [vmem:[#allocation5 + $0x1b0] sm:$0xff]  ;;  %v1032_v53 = vld [vmem:[#allocation5 + $0x168] sm:$0xff]  ;;  %v1023_v56 = vld [vmem:[#allocation5 + $0x120] sm:$0xff] }
  0x1d   :  { %599 = vmatpush.bf16.msra.mxu0 %v990_v16  ;;  %v1049_v51 = vld [vmem:[#allocation5 + $0x1f0] sm:$0xff]  ;;  %v1040_v54 = vld [vmem:[#allocation5 + $0x1a8] sm:$0xff]  ;;  %v1031_v57 = vld [vmem:[#allocation5 + $0x160] sm:$0xff] }
  0x1e   :  { %613 = vmatpush.bf16.msra.mxu1 %v998_v17  ;;  %v1048_v55 = vld [vmem:[#allocation5 + $0x1e8] sm:$0xff]  ;;  %v1039_v58 = vld [vmem:[#allocation5 + $0x1a0] sm:$0xff]  ;;  %v1022_v60 = vld [vmem:[#allocation5 + $0x118] sm:$0xff] }
  0x1f   :  { %627 = vmatpush.bf16.msra.mxu2 %v1006_v18  ;;  %v1047_v59 = vld [vmem:[#allocation5 + $0x1e0] sm:$0xff]  ;;  %v1030_v61 = vld [vmem:[#allocation5 + $0x158] sm:$0xff]  ;;  %v1021_v0 = vld [vmem:[#allocation5 + $0x110] sm:$0xff] }
  0x20   :  { %641 = vmatpush.bf16.msra.mxu3 %v1014_v19  ;;  %v1038_v62 = vld [vmem:[#allocation5 + $0x198] sm:$0xff]  ;;  %v1029_v1 = vld [vmem:[#allocation5 + $0x150] sm:$0xff]  ;;  %v1020_v4 = vld [vmem:[#allocation5 + $0x108] sm:$0xff] }
  0x21   :  { %600 = vmatpush.bf16.msra.mxu0 %v989_v20  ;;  %v1046_v63 = vld [vmem:[#allocation5 + $0x1d8] sm:$0xff]  ;;  %v1037_v2 = vld [vmem:[#allocation5 + $0x190] sm:$0xff]  ;;  %v1028_v5 = vld [vmem:[#allocation5 + $0x148] sm:$0xff] }
  0x22   :  { %614 = vmatpush.bf16.msra.mxu1 %v997_v21  ;;  %v1045_v3 = vld [vmem:[#allocation5 + $0x1d0] sm:$0xff]  ;;  %v1036_v6 = vld [vmem:[#allocation5 + $0x188] sm:$0xff]  ;;  %v1019_v8 = vld [vmem:[#allocation5 + $0x100] sm:$0xff] }
  0x23   :  { %628 = vmatpush.bf16.msra.mxu2 %v1005_v22  ;;  %v1044_v7 = vld [vmem:[#allocation5 + $0x1c8] sm:$0xff]  ;;  %v1027_v9 = vld [vmem:[#allocation5 + $0x140] sm:$0xff]  ;;  %v65_v16 = vld [vmem:[#allocation2 + $0x30] sm:$0xff] }
  0x24   :  { %642 = vmatpush.bf16.msra.mxu3 %v1013_v23  ;;  %v1035_v10 = vld [vmem:[#allocation5 + $0x180] sm:$0xff]  ;;  %v64_v14 = vld [vmem:[#allocation2 + $0x28] sm:$0xff]  ;;  %v73_v17 = vld [vmem:[#allocation2 + $0x70] sm:$0xff] }
  0x25   :  { %601 = vmatpush.bf16.msra.mxu0 %v988_v24  ;;  %v1043_v11 = vld [vmem:[#allocation5 + $0x1c0] sm:$0xff]  ;;  %v72_v15 = vld [vmem:[#allocation2 + $0x68] sm:$0xff]  ;;  %v66_v18 = vld [vmem:[#allocation2 + $0x38] sm:$0xff]  ;;  %v81_v22 = vpack.c.bf16 %v73_v17, %v65_v16 }
  0x26   :  { %615 = vmatpush.bf16.msra.mxu1 %v996_v25  ;;  %v63_v12 = vld [vmem:[#allocation2 + $0x20] sm:$0xff]  ;;  %v74_v19 = vld [vmem:[#allocation2 + $0x78] sm:$0xff]  ;;  %v80_v21 = vpack.c.bf16 %v72_v15, %v64_v14 }
  0x27   :  { %629 = vmatpush.bf16.msra.mxu2 %v1004_v26  ;;  %v71_v13 = vld [vmem:[#allocation2 + $0x60] sm:$0xff]  ;;  %v82_v23 = vpack.c.bf16 %v74_v19, %v66_v18 }
  0x28   :  { %643 = vmatpush.bf16.msra.mxu3 %v1012_v27  ;;  %v79_v20 = vpack.c.bf16 %v71_v13, %v63_v12 }
  0x29   :  { %602 = vmatpush.bf16.msra.mxu0 %v987_v28 }
  0x2a   :  { %616 = vmatpush.bf16.msra.mxu1 %v995_v29 }
  0x2b   :  { %630 = vmatpush.bf16.msra.mxu2 %v1003_v30 }
  0x2c   :  { %644 = vmatpush.bf16.msra.mxu3 %v1011_v31  ;;  %603 = vmatmul.bf16.vlgmr.msra.gmra.mxu0 %v75_v46 }
  0x2d   :  { %651 = vmatpush.bf16.msrb.mxu0 %v1026_v32  ;;  %617 = vmatmul.bf16.vlgmr.msra.gmra.mxu1 %v76_v47 }
  0x2e   :  { %665 = vmatpush.bf16.msrb.mxu1 %v1034_v33  ;;  %631 = vmatmul.bf16.vlgmr.msra.gmra.mxu2 %v77_v44 }
  0x2f   :  { %679 = vmatpush.bf16.msrb.mxu2 %v1042_v42  ;;  %645 = vmatmul.bf16.vlgmr.msra.gmra.mxu3 %v78_v45  ;;  %v1059_v45 = vld [vmem:[%s1180_s2] ss:$0 sm:$0xff]  ;;  %s1144_s2 = smov 128  }
  0x30   :  { %693 = vmatpush.bf16.msrb.mxu3 %v1050_v43 }
  0x31   :  { %652 = vmatpush.bf16.msrb.mxu0 %v1025_v48 }
  0x32   :  { %666 = vmatpush.bf16.msrb.mxu1 %v1033_v49 }
  0x33   :  { %680 = vmatpush.bf16.msrb.mxu2 %v1041_v50 }
  0x34   :  { %694 = vmatpush.bf16.msrb.mxu3 %v1049_v51 }
  0x35   :  { %653 = vmatpush.bf16.msrb.mxu0 %v1024_v52 }
  0x36   :  { %667 = vmatpush.bf16.msrb.mxu1 %v1032_v53 }
  0x37   :  { %681 = vmatpush.bf16.msrb.mxu2 %v1040_v54 }
  0x38   :  { %695 = vmatpush.bf16.msrb.mxu3 %v1048_v55 }
  0x39   :  { %654 = vmatpush.bf16.msrb.mxu0 %v1023_v56 }
  0x3a   :  { %668 = vmatpush.bf16.msrb.mxu1 %v1031_v57 }
  0x3b   :  { %682 = vmatpush.bf16.msrb.mxu2 %v1039_v58 }
  0x3c   :  { %696 = vmatpush.bf16.msrb.mxu3 %v1047_v59 }
  0x3d   :  { %655 = vmatpush.bf16.msrb.mxu0 %v1022_v60 }
  0x3e   :  { %669 = vmatpush.bf16.msrb.mxu1 %v1030_v61 }
  0x3f   :  { %683 = vmatpush.bf16.msrb.mxu2 %v1038_v62 }
  0x40   :  { %697 = vmatpush.bf16.msrb.mxu3 %v1046_v63 }
  0x41   :  { %656 = vmatpush.bf16.msrb.mxu0 %v1021_v0 }
  0x42   :  { %670 = vmatpush.bf16.msrb.mxu1 %v1029_v1 }
  0x43   :  { %684 = vmatpush.bf16.msrb.mxu2 %v1037_v2 }
  0x44   :  { %698 = vmatpush.bf16.msrb.mxu3 %v1045_v3 }
  0x45   :  { %657 = vmatpush.bf16.msrb.mxu0 %v1020_v4 }
  0x46   :  { %671 = vmatpush.bf16.msrb.mxu1 %v1028_v5 }
  0x47   :  { %685 = vmatpush.bf16.msrb.mxu2 %v1036_v6 }
  0x48   :  { %699 = vmatpush.bf16.msrb.mxu3 %v1044_v7 }
  0x49   :  { %658 = vmatpush.bf16.msrb.mxu0 %v1019_v8 }
  0x4a   :  { %672 = vmatpush.bf16.msrb.mxu1 %v1027_v9 }
  0x4b   :  { %686 = vmatpush.bf16.msrb.mxu2 %v1035_v10 }
  0x4c   :  { %700 = vmatpush.bf16.msrb.mxu3 %v1043_v11  ;;  %659 = vmatmul.bf16.vlgmr.msrb.gmra.mxu0 %v79_v20 }
  0x4d   :  { %673 = vmatmul.bf16.vlgmr.msrb.gmra.mxu1 %v80_v21 }
  0x4e   :  { %687 = vmatmul.bf16.vlgmr.msrb.gmra.mxu2 %v81_v22 }
  0x4f   :  { %701 = vmatmul.bf16.vlgmr.msrb.gmra.mxu3 %v82_v23 }
  0xa9   :  { %v604_v24 = vpop.f32.mrf.mxu0 }
  0xaa   :  { %v618_v25 = vpop.f32.mrf.mxu1 }
  0xab   :  { %v619_v28 = vadd.f32 %v618_v25, %v604_v24 }
  0xb1   :  { %v632_v26 = vpop.f32.mrf.mxu2  ;;  %v606_v29 = vpop.f32.mrf.mxu0 }
  0xb2   :  { %v646_v27 = vpop.f32.mrf.mxu3  ;;  %v620_v30 = vpop.f32.mrf.mxu1  ;;  %v633_v31 = vadd.f32 %v632_v26, %v619_v28 }
  0xb3   :  { %v621_v35 = vadd.f32 %v620_v30, %v606_v29 }
  0xb4   :  { %v647_v34 = vadd.f32 %v646_v27, %v633_v31 }
  0xb9   :  { %v634_v32 = vpop.f32.mrf.mxu2 }
  0xba   :  { %v648_v33 = vpop.f32.mrf.mxu3  ;;  %v635_v39 = vadd.f32 %v634_v32, %v621_v35 }
  0xbc   :  { %v649_v43 = vadd.f32 %v648_v33, %v635_v39 }
  0xc9   :  { %v660_v36 = vpop.f32.mrf.mxu0 }
  0xca   :  { %v661_v37 = vadd.f32 %v660_v36, %v647_v34  ;;  %v674_v38 = vpop.f32.mrf.mxu1 }
  0xcc   :  { %v675_v40 = vadd.f32 %v674_v38, %v661_v37 }
  0xd1   :  { %v688_v41 = vpop.f32.mrf.mxu2  ;;  %v662_v46 = vpop.f32.mrf.mxu0 }
  0xd2   :  { %v702_v42 = vpop.f32.mrf.mxu3  ;;  %v689_v44 = vadd.f32 %v688_v41, %v675_v40  ;;  %v663_v48 = vadd.f32 %v662_v46, %v649_v43  ;;  %v676_v50 = vpop.f32.mrf.mxu1 }
  0xd4   :  { %v703_v47 = vadd.f32 %v702_v42, %v689_v44  ;;  %v677_v51 = vadd.f32 %v676_v50, %v663_v48 }
  0xd6   :  { %v707_v49 = vadd.f32 %v1059_v45, %v703_v47 }
  0xd8   :  { %709 = vst [vmem:[#allocation7] sm:$0xff] %v707_v49 }
  0xd9   :  { %v690_v52 = vpop.f32.mrf.mxu2 }
  0xda   :  { %v691_v53 = vadd.f32 %v690_v52, %v677_v51  ;;  %v704_v54 = vpop.f32.mrf.mxu3 }
  0xdc   :  { %v705_v55 = vadd.f32 %v704_v54, %v691_v53 }
  0xde   :  { %v708_v56 = vadd.f32 %v1059_v45, %v705_v55 }
  0xe0   :  { %710 = vst [vmem:[#allocation7 + $0x8] sm:$0xff] %v708_v56 }
  0xe1   :  { %723 = dma.vmem_to_hbm [thread:$0]  %s716_s26, 256, %s718_s29, [#allocation4], %s1144_s2, %s1144_s2, %s1145_s30  }
  0xe2   :  { %1136 = dma.done.wait [#allocation4], 256  }
  0xe3   :  { %1137 = vsyncadd [#allocation4], 4294967040 }
  0xe4   :  { %728 = vsyncpa [#allocation3], 1 }
  0xe5   :  { %729 = vsyncpa [#allocation6], 1 }
  0xe6   :  { %730 = vsyncpa [#allocation4], 1 }

</bundles_post_ra>
